<compile_context>
chip_gen: v7x
topology: tpu7x:2x2x1
jax: 0.10.0
libtpu: 0.0.40
codegen_flags: <defaults>
</compile_context>

<pallas_src>
import functools

import jax
import jax.numpy as jnp
from jax.experimental import pallas as pl
from jax.experimental.pallas import tpu as pltpu


def sac_policy_kernel(
    state_ref,
    w1_ref, b1_ref,
    w2_ref, b2_ref,
    wh_ref, bh_ref,          # fused (mean | log_std) head: (H, 2A), (1, 2A)
    out_ref,                 # fused output (TB, 2A): [:, :A]=mean, [:, A:]=log_std
    *,
    action_dim: int,
    log_std_min: float,
    log_std_max: float,
):
    # Layer 1: (TB, S) @ (S, H), f32 operands (S is tiny), f32 accumulation.
    h = jnp.dot(state_ref[...], w1_ref[...], preferred_element_type=jnp.float32)
    # Bias-add/ReLU chain runs in the bias dtype (bf16 on the fast path, f32
    # otherwise) so the (TB, H) activation never round-trips through f32.
    h = jnp.maximum(h.astype(b1_ref.dtype) + b1_ref[...], 0).astype(w2_ref.dtype)

    # Layer 2: (TB, H) @ (H, H) on the bf16 MXU path when compute_dtype=bf16.
    h = jnp.dot(h, w2_ref[...], preferred_element_type=jnp.float32)
    h = jnp.maximum(h.astype(b2_ref.dtype) + b2_ref[...], 0).astype(wh_ref.dtype)

    # Fused head: (TB, H) @ (H, 2A) -> first A cols = mean, last A = log_std.
    head = jnp.dot(h, wh_ref[...], preferred_element_type=jnp.float32)
    head = head + bh_ref[...].astype(jnp.float32)

    # Clamp only the log_std columns (col >= A); one fused lane-contiguous
    # store, no in-kernel lane slicing.
    col = jax.lax.broadcasted_iota(jnp.int32, head.shape, dimension=1)
    clipped = jnp.clip(head, log_std_min, log_std_max)
    out_ref[...] = jnp.where(col < action_dim, head, clipped).astype(out_ref.dtype)


def init_sac_policy_params(key, state_dim, action_dim, hidden_dim):
    """PyTorch-style nn.Linear init. Weights are (in, out); biases are (1, out)."""
    dims = {
        "1": (state_dim, hidden_dim),
        "2": (hidden_dim, hidden_dim),
        "_mean": (hidden_dim, action_dim),
        "_log_std": (hidden_dim, action_dim),
    }
    params = {}
    keys = jax.random.split(key, 2 * len(dims))
    for i, (name, (din, dout)) in enumerate(dims.items()):
        bound = 1.0 / float(jnp.sqrt(jnp.float32(din)))
        params[f"w{name}"] = jax.random.uniform(
            keys[2 * i], (din, dout), jnp.float32, minval=-bound, maxval=bound)
        params[f"b{name}"] = jax.random.uniform(
            keys[2 * i + 1], (1, dout), jnp.float32, minval=-bound, maxval=bound)
    return params


def _round_up(x, m):
    return ((x + m - 1) // m) * m


def _make_specs(TB, state_dim, H, A, weight_buffer_count):
    """BlockSpecs: batch-tiled state/output, resident weights/biases."""
    if weight_buffer_count is None:
        resident = lambda shape: pl.BlockSpec(shape, lambda i: (0, 0))
    else:
        resident = lambda shape: pl.BlockSpec(
            shape, lambda i: (0, 0),
            pipeline_mode=pl.Buffered(weight_buffer_count))
    in_specs = [
        pl.BlockSpec((TB, state_dim), lambda i: (i, 0)),
        resident((state_dim, H)),
        resident((1, H)),
        resident((H, H)),
        resident((1, H)),
        resident((H, 2 * A)),
        resident((1, 2 * A)),
    ]
    out_specs = pl.BlockSpec((TB, 2 * A), lambda i: (i, 0))
    return in_specs, out_specs


def sac_policy_forward(state, params, *, log_std_min=-20.0, log_std_max=2.0,
                       compute_dtype=jnp.float32):
    """SACPolicy.forward -> (mean, log_std).

    compute_dtype=jnp.bfloat16 puts the (H,H)/head matmuls AND the bias+ReLU
    chain on the bf16 path (bf16 MXU rate on v5e/v6e/v7x, bf16 VPU on
    v6e/v7x).  Layer-1 operands (state, w1) stay f32 regardless, so raw
    unnormalized states are never quantized to bf16.
    """
    B, state_dim = state.shape
    H = params["w1"].shape[1]
    A = params["w_mean"].shape[1]

    # Fuse the two heads into a single (H, 2A) matmul (built in glue, once).
    wh = jnp.concatenate([params["w_mean"], params["w_log_std"]], axis=1)
    bh = jnp.concatenate([params["b_mean"], params["b_log_std"]], axis=1)

    x = state.astype(jnp.float32)
    w1 = params["w1"].astype(jnp.float32)
    b1 = params["b1"].astype(compute_dtype)
    w2 = params["w2"].astype(compute_dtype)
    b2 = params["b2"].astype(compute_dtype)
    wh = wh.astype(compute_dtype)
    bh = bh.astype(jnp.float32)   # head epilogue (clip) stays f32

    # Batch tile: step-overhead bound -> use large tiles (up to 2048 rows),
    # but force >= 2 grid steps for B > 16 so v7x can use both TensorCores.
    TB_MAX = 2048
    if B <= 16:
        TB = B                                        # single step, block == array
    else:
        TB = min(TB_MAX, _round_up(pl.cdiv(B, 2), 8))  # multiple of 8 sublanes
    grid = (pl.cdiv(B, TB),)

    kernel = functools.partial(
        sac_policy_kernel,
        action_dim=A,
        log_std_min=float(log_std_min),
        log_std_max=float(log_std_max),
    )

    flops = 2 * B * (state_dim * H + H * H + H * 2 * A)
    bytes_accessed = (
        sum(int(a.size) * a.dtype.itemsize for a in (x, w1, b1, w2, b2, wh, bh))
        + B * 2 * A * 4
    )
    cost = pl.CostEstimate(flops=flops, transcendentals=0,
                           bytes_accessed=bytes_accessed)

    def call(weight_buffer_count):
        in_specs, out_specs = _make_specs(TB, state_dim, H, A, weight_buffer_count)
        return pl.pallas_call(
            kernel,
            out_shape=jax.ShapeDtypeStruct((B, 2 * A), jnp.float32),
            grid_spec=pltpu.PrefetchScalarGridSpec(
                num_scalar_prefetch=0,
                grid=grid,
                in_specs=in_specs,
                out_specs=out_specs,
            ),
            compiler_params=pltpu.CompilerParams(
                dimension_semantics=("parallel",),
            ),
            cost_estimate=cost,
        )(x, w1, b1, w2, b2, wh, bh)

    try:
        # Single-buffer the resident (constant index_map) weights/biases.
        out = call(1)
    except Exception:
        # Fallback if this jax build rejects Buffered(1): default buffering.
        out = call(None)

    # Free slices in the wrapper: mean = first A cols, log_std = last A cols.
    return out[:, :A], out[:, A:]


# TODO(synk): SACPolicy.sample() (Normal.rsample + tanh-squash log-prob) needs
# RNG and is not part of forward(); compose it from (mean, log_std) outside
# the kernel.


def _ref_forward(state, params, log_std_min=-20.0, log_std_max=2.0):
    h = jnp.maximum(state @ params["w1"] + params["b1"], 0.0)
    h = jnp.maximum(h @ params["w2"] + params["b2"], 0.0)
    mean = h @ params["w_mean"] + params["b_mean"]
    log_std = jnp.clip(h @ params["w_log_std"] + params["b_log_std"],
                       log_std_min, log_std_max)
    return mean, log_std


if __name__ == "__main__":
    # Small shapes consistent with the module (hidden_dim matches the default).
    batch = 4
    state_dim = 8
    action_dim = 4
    hidden_dim = 256

    root = jax.random.PRNGKey(0)
    k_params, k_state = jax.random.split(root, 2)

    params = init_sac_policy_params(k_params, state_dim, action_dim, hidden_dim)
    state = jax.random.normal(k_state, (batch, state_dim), jnp.float32)

    # f32 path: must match the plain-JAX reference tightly.
    mean, log_std = sac_policy_forward(state, params)
    jax.block_until_ready((mean, log_std))

    r_mean, r_log_std = _ref_forward(state, params)
    assert mean.shape == (batch, action_dim)
    assert log_std.shape == (batch, action_dim)
    assert jnp.allclose(mean, r_mean, atol=1e-5)
    assert jnp.allclose(log_std, r_log_std, atol=1e-5)

    # bf16 fast path (layer-1 stays f32): f32 accumulation, loose tolerance.
    mean_bf, log_std_bf = sac_policy_forward(state, params,
                                             compute_dtype=jnp.bfloat16)
    jax.block_until_ready((mean_bf, log_std_bf))
    assert bool(jnp.all(jnp.isfinite(mean_bf)))
    assert float(jnp.max(jnp.abs(mean_bf - r_mean))) < 5e-2
    assert float(jnp.max(jnp.abs(log_std_bf - r_log_std))) < 5e-2

    # Larger batch exercises the multi-step ("parallel") grid path.
    state_big = jax.random.normal(jax.random.PRNGKey(1), (40, state_dim),
                                  jnp.float32)
    mean_b, log_std_b = sac_policy_forward(state_big, params)
    jax.block_until_ready((mean_b, log_std_b))
    rb_mean, rb_log_std = _ref_forward(state_big, params)
    assert jnp.allclose(mean_b, rb_mean, atol=1e-5)
    assert jnp.allclose(log_std_b, rb_log_std, atol=1e-5)

    print("KERNEL_OK")
</pallas_src>

<mosaic_0001>
module attributes {stable_mosaic.version = 11 : i64} {
  func.func @sac_policy_kernel(%arg0: i32, %arg1: memref<4x8xf32, #tpu.memory_space<vmem>>, %arg2: memref<8x256xf32, #tpu.memory_space<vmem>>, %arg3: memref<1x256xf32, #tpu.memory_space<vmem>>, %arg4: memref<256x256xf32, #tpu.memory_space<vmem>>, %arg5: memref<1x256xf32, #tpu.memory_space<vmem>>, %arg6: memref<256x8xf32, #tpu.memory_space<vmem>>, %arg7: memref<1x8xf32, #tpu.memory_space<vmem>>, %arg8: memref<4x8xf32, #tpu.memory_space<vmem>>) attributes {dimension_semantics = [#tpu.dimension_semantics<parallel>], iteration_bounds = array<i64: 1>, scalar_prefetch = 0 : i64, scratch_operands = 0 : i64, tpu.core_type = #tpu.core_type<tc>, window_params = [{transform_indices = @transform_0, window_bounds = array<i64: 4, 8>}, {pipeline_mode = #tpu.pipeline_mode<synchronous>, transform_indices = @transform_1, window_bounds = array<i64: 8, 256>}, {pipeline_mode = #tpu.pipeline_mode<synchronous>, transform_indices = @transform_2, window_bounds = array<i64: 1, 256>}, {pipeline_mode = #tpu.pipeline_mode<synchronous>, transform_indices = @transform_3, window_bounds = array<i64: 256, 256>}, {pipeline_mode = #tpu.pipeline_mode<synchronous>, transform_indices = @transform_4, window_bounds = array<i64: 1, 256>}, {pipeline_mode = #tpu.pipeline_mode<synchronous>, transform_indices = @transform_5, window_bounds = array<i64: 256, 8>}, {pipeline_mode = #tpu.pipeline_mode<synchronous>, transform_indices = @transform_6, window_bounds = array<i64: 1, 8>}, {transform_indices = @transform_7, window_bounds = array<i64: 4, 8>}]} {
    %c0 = arith.constant 0 : index
    %c0_0 = arith.constant 0 : index
    %0 = vector.load %arg1[%c0, %c0_0] : memref<4x8xf32, #tpu.memory_space<vmem>>, vector<4x8xf32>
    %c0_1 = arith.constant 0 : index
    %c0_2 = arith.constant 0 : index
    %1 = vector.load %arg2[%c0_1, %c0_2] : memref<8x256xf32, #tpu.memory_space<vmem>>, vector<8x256xf32>
    %cst = arith.constant dense<0.000000e+00> : vector<4x256xf32>
    %2 = tpu.matmul %0, %1, %cst {dimension_numbers = #tpu.dot_dimension_numbers<[1], [0], [0], [1], [0, 0, 1, 1], [], []>} : vector<4x8xf32>, vector<8x256xf32>, vector<4x256xf32> -> vector<4x256xf32>
    %c0_3 = arith.constant 0 : index
    %c0_4 = arith.constant 0 : index
    %3 = vector.load %arg3[%c0_3, %c0_4] : memref<1x256xf32, #tpu.memory_space<vmem>>, vector<1x256xf32>
    %4 = vector.broadcast %3 : vector<1x256xf32> to vector<4x256xf32>
    %5 = arith.addf %2, %4 : vector<4x256xf32>
    %cst_5 = arith.constant 0.000000e+00 : f32
    %6 = vector.broadcast %cst_5 : f32 to vector<4x256xf32>
    %7 = arith.maximumf %5, %6 : vector<4x256xf32>
    %c0_6 = arith.constant 0 : index
    %c0_7 = arith.constant 0 : index
    %8 = vector.load %arg4[%c0_6, %c0_7] : memref<256x256xf32, #tpu.memory_space<vmem>>, vector<256x256xf32>
    %cst_8 = arith.constant dense<0.000000e+00> : vector<4x256xf32>
    %9 = tpu.matmul %7, %8, %cst_8 {dimension_numbers = #tpu.dot_dimension_numbers<[1], [0], [0], [1], [0, 0, 1, 1], [], []>} : vector<4x256xf32>, vector<256x256xf32>, vector<4x256xf32> -> vector<4x256xf32>
    %c0_9 = arith.constant 0 : index
    %c0_10 = arith.constant 0 : index
    %10 = vector.load %arg5[%c0_9, %c0_10] : memref<1x256xf32, #tpu.memory_space<vmem>>, vector<1x256xf32>
    %11 = vector.broadcast %10 : vector<1x256xf32> to vector<4x256xf32>
    %12 = arith.addf %9, %11 : vector<4x256xf32>
    %cst_11 = arith.constant 0.000000e+00 : f32
    %13 = vector.broadcast %cst_11 : f32 to vector<4x256xf32>
    %14 = arith.maximumf %12, %13 : vector<4x256xf32>
    %c0_12 = arith.constant 0 : index
    %c0_13 = arith.constant 0 : index
    %15 = vector.load %arg6[%c0_12, %c0_13] : memref<256x8xf32, #tpu.memory_space<vmem>>, vector<256x8xf32>
    %cst_14 = arith.constant dense<0.000000e+00> : vector<4x8xf32>
    %16 = tpu.matmul %14, %15, %cst_14 {dimension_numbers = #tpu.dot_dimension_numbers<[1], [0], [0], [1], [0, 0, 1, 1], [], []>} : vector<4x256xf32>, vector<256x8xf32>, vector<4x8xf32> -> vector<4x8xf32>
    %c0_15 = arith.constant 0 : index
    %c0_16 = arith.constant 0 : index
    %17 = vector.load %arg7[%c0_15, %c0_16] : memref<1x8xf32, #tpu.memory_space<vmem>>, vector<1x8xf32>
    %18 = vector.broadcast %17 : vector<1x8xf32> to vector<4x8xf32>
    %19 = arith.addf %16, %18 : vector<4x8xf32>
    %20 = tpu.iota {dimensions = array<i32: 1>} : vector<4x8xi32>
    %cst_17 = arith.constant -2.000000e+01 : f32
    %cst_18 = arith.constant 2.000000e+00 : f32
    %21 = vector.broadcast %cst_17 : f32 to vector<4x8xf32>
    %22 = arith.maximumf %21, %19 : vector<4x8xf32>
    %23 = vector.broadcast %cst_18 : f32 to vector<4x8xf32>
    %24 = arith.minimumf %23, %22 : vector<4x8xf32>
    %c4_i32 = arith.constant 4 : i32
    %25 = vector.broadcast %c4_i32 : i32 to vector<4x8xi32>
    %26 = arith.cmpi slt, %20, %25 : vector<4x8xi32>
    %27 = arith.select %26, %19, %24 : vector<4x8xi1>, vector<4x8xf32>
    %c0_19 = arith.constant 0 : index
    %c0_20 = arith.constant 0 : index
    %28 = vector.load %arg8[%c0_19, %c0_20] : memref<4x8xf32, #tpu.memory_space<vmem>>, vector<4x8xf32>
    tpu.vector_store %arg8[%c0_19, %c0_20], %27 {strides = array<i32>} : memref<4x8xf32, #tpu.memory_space<vmem>>, vector<4x8xf32>,
    return
  }
  func.func @transform_0(%arg0: i32) -> (i32, i32) {
    %c0_i32 = arith.constant 0 : i32
    %c0_i32_0 = arith.constant 0 : i32
    return %arg0, %c0_i32 : i32, i32
  }
  func.func @transform_1(%arg0: i32) -> (i32, i32) {
    %c0_i32 = arith.constant 0 : i32
    %c0_i32_0 = arith.constant 0 : i32
    %c0_i32_1 = arith.constant 0 : i32
    return %c0_i32, %c0_i32_0 : i32, i32
  }
  func.func @transform_2(%arg0: i32) -> (i32, i32) {
    %c0_i32 = arith.constant 0 : i32
    %c0_i32_0 = arith.constant 0 : i32
    %c0_i32_1 = arith.constant 0 : i32
    return %c0_i32, %c0_i32_0 : i32, i32
  }
  func.func @transform_3(%arg0: i32) -> (i32, i32) {
    %c0_i32 = arith.constant 0 : i32
    %c0_i32_0 = arith.constant 0 : i32
    %c0_i32_1 = arith.constant 0 : i32
    return %c0_i32, %c0_i32_0 : i32, i32
  }
  func.func @transform_4(%arg0: i32) -> (i32, i32) {
    %c0_i32 = arith.constant 0 : i32
    %c0_i32_0 = arith.constant 0 : i32
    %c0_i32_1 = arith.constant 0 : i32
    return %c0_i32, %c0_i32_0 : i32, i32
  }
  func.func @transform_5(%arg0: i32) -> (i32, i32) {
    %c0_i32 = arith.constant 0 : i32
    %c0_i32_0 = arith.constant 0 : i32
    %c0_i32_1 = arith.constant 0 : i32
    return %c0_i32, %c0_i32_0 : i32, i32
  }
  func.func @transform_6(%arg0: i32) -> (i32, i32) {
    %c0_i32 = arith.constant 0 : i32
    %c0_i32_0 = arith.constant 0 : i32
    %c0_i32_1 = arith.constant 0 : i32
    return %c0_i32, %c0_i32_0 : i32, i32
  }
  func.func @transform_7(%arg0: i32) -> (i32, i32) {
    %c0_i32 = arith.constant 0 : i32
    %c0_i32_0 = arith.constant 0 : i32
    return %arg0, %c0_i32 : i32, i32
  }
}

module attributes {stable_mosaic.version = 11 : i64} {
  func.func @sac_policy_kernel(%arg0: i32, %arg1: memref<4x8xf32, #tpu.memory_space<vmem>>, %arg2: memref<8x256xf32, #tpu.memory_space<vmem>>, %arg3: memref<1x256xf32, #tpu.memory_space<vmem>>, %arg4: memref<256x256xf32, #tpu.memory_space<vmem>>, %arg5: memref<1x256xf32, #tpu.memory_space<vmem>>, %arg6: memref<256x8xf32, #tpu.memory_space<vmem>>, %arg7: memref<1x8xf32, #tpu.memory_space<vmem>>, %arg8: memref<4x8xf32, #tpu.memory_space<vmem>>) attributes {dimension_semantics = [#tpu.dimension_semantics<parallel>], iteration_bounds = array<i64: 1>, scalar_prefetch = 0 : i64, scratch_operands = 0 : i64, tpu.core_type = #tpu.core_type<tc>, window_params = [{transform_indices = @transform_0, window_bounds = array<i64: 4, 8>}, {pipeline_mode = #tpu.pipeline_mode<synchronous>, transform_indices = @transform_1, window_bounds = array<i64: 8, 256>}, {pipeline_mode = #tpu.pipeline_mode<synchronous>, transform_indices = @transform_2, window_bounds = array<i64: 1, 256>}, {pipeline_mode = #tpu.pipeline_mode<synchronous>, transform_indices = @transform_3, window_bounds = array<i64: 256, 256>}, {pipeline_mode = #tpu.pipeline_mode<synchronous>, transform_indices = @transform_4, window_bounds = array<i64: 1, 256>}, {pipeline_mode = #tpu.pipeline_mode<synchronous>, transform_indices = @transform_5, window_bounds = array<i64: 256, 8>}, {pipeline_mode = #tpu.pipeline_mode<synchronous>, transform_indices = @transform_6, window_bounds = array<i64: 1, 8>}, {transform_indices = @transform_7, window_bounds = array<i64: 4, 8>}]} {
    %c0 = arith.constant 0 : index
    %c0_0 = arith.constant 0 : index
    %0 = vector.load %arg1[%c0, %c0_0] : memref<4x8xf32, #tpu.memory_space<vmem>>, vector<4x8xf32>
    %c0_1 = arith.constant 0 : index
    %c0_2 = arith.constant 0 : index
    %1 = vector.load %arg2[%c0_1, %c0_2] : memref<8x256xf32, #tpu.memory_space<vmem>>, vector<8x256xf32>
    %cst = arith.constant dense<0.000000e+00> : vector<4x256xf32>
    %2 = tpu.matmul %0, %1, %cst {dimension_numbers = #tpu.dot_dimension_numbers<[1], [0], [0], [1], [0, 0, 1, 1], [], []>} : vector<4x8xf32>, vector<8x256xf32>, vector<4x256xf32> -> vector<4x256xf32>
    %c0_3 = arith.constant 0 : index
    %c0_4 = arith.constant 0 : index
    %3 = vector.load %arg3[%c0_3, %c0_4] : memref<1x256xf32, #tpu.memory_space<vmem>>, vector<1x256xf32>
    %4 = vector.broadcast %3 : vector<1x256xf32> to vector<4x256xf32>
    %5 = arith.addf %2, %4 : vector<4x256xf32>
    %cst_5 = arith.constant 0.000000e+00 : f32
    %6 = vector.broadcast %cst_5 : f32 to vector<4x256xf32>
    %7 = arith.maximumf %5, %6 : vector<4x256xf32>
    %c0_6 = arith.constant 0 : index
    %c0_7 = arith.constant 0 : index
    %8 = vector.load %arg4[%c0_6, %c0_7] : memref<256x256xf32, #tpu.memory_space<vmem>>, vector<256x256xf32>
    %cst_8 = arith.constant dense<0.000000e+00> : vector<4x256xf32>
    %9 = tpu.matmul %7, %8, %cst_8 {dimension_numbers = #tpu.dot_dimension_numbers<[1], [0], [0], [1], [0, 0, 1, 1], [], []>} : vector<4x256xf32>, vector<256x256xf32>, vector<4x256xf32> -> vector<4x256xf32>
    %c0_9 = arith.constant 0 : index
    %c0_10 = arith.constant 0 : index
    %10 = vector.load %arg5[%c0_9, %c0_10] : memref<1x256xf32, #tpu.memory_space<vmem>>, vector<1x256xf32>
    %11 = vector.broadcast %10 : vector<1x256xf32> to vector<4x256xf32>
    %12 = arith.addf %9, %11 : vector<4x256xf32>
    %cst_11 = arith.constant 0.000000e+00 : f32
    %13 = vector.broadcast %cst_11 : f32 to vector<4x256xf32>
    %14 = arith.maximumf %12, %13 : vector<4x256xf32>
    %c0_12 = arith.constant 0 : index
    %c0_13 = arith.constant 0 : index
    %15 = vector.load %arg6[%c0_12, %c0_13] : memref<256x8xf32, #tpu.memory_space<vmem>>, vector<256x8xf32>
    %cst_14 = arith.constant dense<0.000000e+00> : vector<4x8xf32>
    %16 = tpu.matmul %14, %15, %cst_14 {dimension_numbers = #tpu.dot_dimension_numbers<[1], [0], [0], [1], [0, 0, 1, 1], [], []>} : vector<4x256xf32>, vector<256x8xf32>, vector<4x8xf32> -> vector<4x8xf32>
    %c0_15 = arith.constant 0 : index
    %c0_16 = arith.constant 0 : index
    %17 = vector.load %arg7[%c0_15, %c0_16] : memref<1x8xf32, #tpu.memory_space<vmem>>, vector<1x8xf32>
    %18 = vector.broadcast %17 : vector<1x8xf32> to vector<4x8xf32>
    %19 = arith.addf %16, %18 : vector<4x8xf32>
    %20 = tpu.iota {dimensions = array<i32: 1>} : vector<4x8xi32>
    %cst_17 = arith.constant -2.000000e+01 : f32
    %cst_18 = arith.constant 2.000000e+00 : f32
    %21 = vector.broadcast %cst_17 : f32 to vector<4x8xf32>
    %22 = arith.maximumf %21, %19 : vector<4x8xf32>
    %23 = vector.broadcast %cst_18 : f32 to vector<4x8xf32>
    %24 = arith.minimumf %23, %22 : vector<4x8xf32>
    %c4_i32 = arith.constant 4 : i32
    %25 = vector.broadcast %c4_i32 : i32 to vector<4x8xi32>
    %26 = arith.cmpi slt, %20, %25 : vector<4x8xi32>
    %27 = arith.select %26, %19, %24 : vector<4x8xi1>, vector<4x8xf32>
    %c0_19 = arith.constant 0 : index
    %c0_20 = arith.constant 0 : index
    %28 = vector.load %arg8[%c0_19, %c0_20] : memref<4x8xf32, #tpu.memory_space<vmem>>, vector<4x8xf32>
    tpu.vector_store %arg8[%c0_19, %c0_20], %27 {strides = array<i32>} : memref<4x8xf32, #tpu.memory_space<vmem>>, vector<4x8xf32>,
    return
  }
  func.func @transform_0(%arg0: i32) -> (i32, i32) {
    %c0_i32 = arith.constant 0 : i32
    %c0_i32_0 = arith.constant 0 : i32
    return %arg0, %c0_i32 : i32, i32
  }
  func.func @transform_1(%arg0: i32) -> (i32, i32) {
    %c0_i32 = arith.constant 0 : i32
    %c0_i32_0 = arith.constant 0 : i32
    %c0_i32_1 = arith.constant 0 : i32
    return %c0_i32, %c0_i32_0 : i32, i32
  }
  func.func @transform_2(%arg0: i32) -> (i32, i32) {
    %c0_i32 = arith.constant 0 : i32
    %c0_i32_0 = arith.constant 0 : i32
    %c0_i32_1 = arith.constant 0 : i32
    return %c0_i32, %c0_i32_0 : i32, i32
  }
  func.func @transform_3(%arg0: i32) -> (i32, i32) {
    %c0_i32 = arith.constant 0 : i32
    %c0_i32_0 = arith.constant 0 : i32
    %c0_i32_1 = arith.constant 0 : i32
    return %c0_i32, %c0_i32_0 : i32, i32
  }
  func.func @transform_4(%arg0: i32) -> (i32, i32) {
    %c0_i32 = arith.constant 0 : i32
    %c0_i32_0 = arith.constant 0 : i32
    %c0_i32_1 = arith.constant 0 : i32
    return %c0_i32, %c0_i32_0 : i32, i32
  }
  func.func @transform_5(%arg0: i32) -> (i32, i32) {
    %c0_i32 = arith.constant 0 : i32
    %c0_i32_0 = arith.constant 0 : i32
    %c0_i32_1 = arith.constant 0 : i32
    return %c0_i32, %c0_i32_0 : i32, i32
  }
  func.func @transform_6(%arg0: i32) -> (i32, i32) {
    %c0_i32 = arith.constant 0 : i32
    %c0_i32_0 = arith.constant 0 : i32
    %c0_i32_1 = arith.constant 0 : i32
    return %c0_i32, %c0_i32_0 : i32, i32
  }
  func.func @transform_7(%arg0: i32) -> (i32, i32) {
    %c0_i32 = arith.constant 0 : i32
    %c0_i32_0 = arith.constant 0 : i32
    return %arg0, %c0_i32 : i32, i32
  }
}

</mosaic_0001>

<bundles_post_ra>
// kernel: tpu_custom_call.1
= control target key start
LH: loop header
LB: loop body
LE: loop exit
PB: predicated region body
PF: predicated region fallthrough
CT: control target
= control target key end

     0   :  { %12 = vsyncpa [#allocation3], 0  ;;  %s783_s0 = inlined_call_operand.vmem [shape: f32[4,8], index: 0, kind: input, shape index: {}]   ;;  %s784_s1 = inlined_call_operand.vmem [shape: f32[8,256], index: 1, kind: input, shape index: {}]   ;;  %s785_s2 = inlined_call_operand.vmem [shape: f32[1,256], index: 2, kind: input, shape index: {}]   ;;  %s786_s3 = inlined_call_operand.hbm [shape: f32[256,256], index: 3, kind: input, shape index: {}]   ;;  %s787_s4 = inlined_call_operand.vmem [shape: f32[1,256], index: 4, kind: input, shape index: {}]   ;;  %s788_s5 = inlined_call_operand.vmem [shape: f32[256,8], index: 5, kind: input, shape index: {}]   ;;  %s789_s6 = inlined_call_operand.vmem [shape: f32[1,8], index: 6, kind: input, shape index: {}]   ;;  %s790_s7 = inlined_call_operand.hbm [shape: f32[4,8], index: 7, kind: output, shape index: {}]  }
   0x1   :  { %13 = vsyncpa [#allocation4], 0  ;;  %s600_s24 = smov [#allocation2]   ;;  %s552_s28 = scalar_lea.hbm %s786_s3, 8192 }
   0x2   :  { %s25_s25 = sshll.u32 %s600_s24, 4  ;;  %p553_p0 = scmp.ne.s32.totalorder %s786_s3, %s552_s28  ;;  %s26_s25 = int_to_ptr.vmem [resolvable:$true] %s25_s25 }
   0x3   :  { %p556_p1 = scmp.lt.u32.totalorder %s552_s28, %s786_s3 }
   0x5   :  { %p558_p2 = pnand %p556_p1, %p553_p0 }
   0x7   :  { %561 = shalt.err (!%p558_p2)
}
   0x8   :  { %s562_s10 = scalar_lea.vmem %s26_s25, 8192  ;;  %p567_p4 = scmp.lt.s32.totalorder %s26_s25, %s26_s25 }
   0x9   :  { %p563_p3 = scmp.ne.s32.totalorder %s26_s25, %s562_s10  ;;  %p568_p5 = scmp.lt.s32.totalorder %s562_s10, %s562_s10 }
   0xb   :  { %p569_p6 = por %p568_p5, %p567_p4 }
   0xd   :  { %p570_p7 = pnand %p569_p6, %p563_p3 }
   0xf   :  { %573 = shalt.err (!%p570_p7)
}
  0x10   :  { %s601_s11 = smov 256   ;;  %s602_s12 = smov 16  }
  0x11   :  { %31 = dma.hbm_to_vmem [thread:$0]  %s786_s3, 8192, %s26_s25, [#allocation3], %s601_s11, %s601_s11, %s602_s12  }
  0x12   :  { %596 = dma.done.wait [#allocation3], 8192  }
  0x13   :  { %597 = vsyncadd [#allocation3], 4294959104  ;;  %v603_v0 = vmov 0.0   ;;  %v43_v1 = vld [vmem:[%s784_s1 + $0x8] sm:$0xff]  ;;  %v42_v2 = vld [vmem:[%s784_s1] sm:$0xff]  ;;  %vm56_vm0 = vcmask 64512  }
  0x14   :  { %124 = vmatprep.mubr.f32.mxu0 %v603_v0  ;;  %v41_v3 = vld [vmem:[%s783_s0] sm:$0xf]  ;;  %60 = vmatprep.subr.mxu0 %v43_v1  ;;  %v134_v4 = vld [vmem:[#allocation2 + $0x8] sm:$0xff]  ;;  %v136_v5 = vld [vmem:[#allocation2 + $0x18] sm:$0xff]  ;;  %vm397_vm2 = vcmask 60416  }
  0x15   :  { %v133_v6 = vld [vmem:[#allocation2] sm:$0xff]  ;;  %61 = vmatpush1.msra.mxu0 %v42_v2  ;;  %v451_v7 = vpack.c.bf16 %v136_v5, %v134_v4  ;;  %v135_v8 = vld [vmem:[#allocation2 + $0x10] sm:$0xff]  ;;  %v138_v9 = vld [vmem:[#allocation2 + $0x28] sm:$0xff] }
  0x16   :  { %v140_v10 = vld [vmem:[#allocation2 + $0x38] sm:$0xff]  ;;  %414 = vmatmul.mubr.msk.f32.vlgmr.msra.gmra.mrb[0].mxu0 %vm56_vm0, %v41_v3  ;;  %v453_v11 = vpack.c.bf16 %v135_v8, %v133_v6  ;;  %v137_v13 = vld [vmem:[#allocation2 + $0x20] sm:$0xff]  ;;  %v139_v14 = vld [vmem:[#allocation2 + $0x30] sm:$0xff] }
  0x17   :  { %v455_v12 = vpack.c.bf16 %v140_v10, %v138_v9  ;;  %v142_v15 = vld [vmem:[#allocation2 + $0x48] sm:$0xff]  ;;  %452 = vmatprep.subr.bf16.mxu1 %v451_v7  ;;  %v144_v16 = vld [vmem:[#allocation2 + $0x58] sm:$0xff]  ;;  %v457_v17 = vpack.c.bf16 %v139_v14, %v137_v13  ;;  %v141_v19 = vld [vmem:[#allocation2 + $0x40] sm:$0xff] }
  0x18   :  { %454 = vmatpush1.bf16.msra.mxu1 %v453_v11  ;;  %v459_v18 = vpack.c.bf16 %v144_v16, %v142_v15  ;;  %v143_v20 = vld [vmem:[#allocation2 + $0x50] sm:$0xff]  ;;  %v146_v21 = vld [vmem:[#allocation2 + $0x68] sm:$0xff]  ;;  %v148_v22 = vld [vmem:[#allocation2 + $0x78] sm:$0xff] }
  0x19   :  { %456 = vmatprep.subr.bf16.mxu1 %v455_v12  ;;  %v461_v23 = vpack.c.bf16 %v143_v20, %v141_v19  ;;  %v463_v24 = vpack.c.bf16 %v148_v22, %v146_v21  ;;  %v145_v25 = vld [vmem:[#allocation2 + $0x60] sm:$0xff]  ;;  %v147_v26 = vld [vmem:[#allocation2 + $0x70] sm:$0xff]  ;;  %v150_v27 = vld [vmem:[#allocation2 + $0x88] sm:$0xff] }
  0x1a   :  { %v152_v28 = vld [vmem:[#allocation2 + $0x98] sm:$0xff]  ;;  %v465_v29 = vpack.c.bf16 %v147_v26, %v145_v25  ;;  %v149_v31 = vld [vmem:[#allocation2 + $0x80] sm:$0xff]  ;;  %v151_v32 = vld [vmem:[#allocation2 + $0x90] sm:$0xff] }
  0x1b   :  { %v467_v30 = vpack.c.bf16 %v152_v28, %v150_v27  ;;  %v154_v33 = vld [vmem:[#allocation2 + $0xa8] sm:$0xff]  ;;  %v156_v34 = vld [vmem:[#allocation2 + $0xb8] sm:$0xff]  ;;  %v469_v35 = vpack.c.bf16 %v151_v32, %v149_v31  ;;  %v153_v37 = vld [vmem:[#allocation2 + $0xa0] sm:$0xff] }
  0x1c   :  { %458 = vmatpush1.bf16.msra.mxu1 %v457_v17  ;;  %v471_v36 = vpack.c.bf16 %v156_v34, %v154_v33  ;;  %v155_v38 = vld [vmem:[#allocation2 + $0xb0] sm:$0xff]  ;;  %v158_v39 = vld [vmem:[#allocation2 + $0xc8] sm:$0xff]  ;;  %v160_v40 = vld [vmem:[#allocation2 + $0xd8] sm:$0xff] }
  0x1d   :  { %460 = vmatprep.subr.bf16.mxu1 %v459_v18  ;;  %v473_v41 = vpack.c.bf16 %v155_v38, %v153_v37  ;;  %v475_v42 = vpack.c.bf16 %v160_v40, %v158_v39  ;;  %v157_v43 = vld [vmem:[#allocation2 + $0xc0] sm:$0xff]  ;;  %v159_v44 = vld [vmem:[#allocation2 + $0xd0] sm:$0xff]  ;;  %v162_v45 = vld [vmem:[#allocation2 + $0xe8] sm:$0xff] }
  0x1e   :  { %v164_v46 = vld [vmem:[#allocation2 + $0xf8] sm:$0xff]  ;;  %v477_v47 = vpack.c.bf16 %v159_v44, %v157_v43  ;;  %v161_v49 = vld [vmem:[#allocation2 + $0xe0] sm:$0xff]  ;;  %v163_v50 = vld [vmem:[#allocation2 + $0xf0] sm:$0xff] }
  0x1f   :  { %v479_v48 = vpack.c.bf16 %v164_v46, %v162_v45  ;;  %v166_v51 = vld [vmem:[#allocation2 + $0x108] sm:$0xff]  ;;  %v168_v52 = vld [vmem:[#allocation2 + $0x118] sm:$0xff]  ;;  %v481_v53 = vpack.c.bf16 %v163_v50, %v161_v49  ;;  %v165_v55 = vld [vmem:[#allocation2 + $0x100] sm:$0xff] }
  0x20   :  { %462 = vmatpush1.bf16.msra.mxu1 %v461_v23  ;;  %v483_v54 = vpack.c.bf16 %v168_v52, %v166_v51  ;;  %v167_v56 = vld [vmem:[#allocation2 + $0x110] sm:$0xff]  ;;  %v170_v57 = vld [vmem:[#allocation2 + $0x128] sm:$0xff]  ;;  %v172_v58 = vld [vmem:[#allocation2 + $0x138] sm:$0xff] }
  0x21   :  { %464 = vmatprep.subr.bf16.mxu1 %v463_v24  ;;  %v485_v59 = vpack.c.bf16 %v167_v56, %v165_v55  ;;  %v487_v60 = vpack.c.bf16 %v172_v58, %v170_v57  ;;  %v169_v61 = vld [vmem:[#allocation2 + $0x120] sm:$0xff]  ;;  %v171_v62 = vld [vmem:[#allocation2 + $0x130] sm:$0xff]  ;;  %v174_v63 = vld [vmem:[#allocation2 + $0x148] sm:$0xff] }
  0x22   :  { %v176_v0 = vld [vmem:[#allocation2 + $0x158] sm:$0xff]  ;;  %v489_v1 = vpack.c.bf16 %v171_v62, %v169_v61  ;;  %v173_v3 = vld [vmem:[#allocation2 + $0x140] sm:$0xff]  ;;  %v175_v4 = vld [vmem:[#allocation2 + $0x150] sm:$0xff] }
  0x23   :  { %v491_v2 = vpack.c.bf16 %v176_v0, %v174_v63  ;;  %v178_v5 = vld [vmem:[#allocation2 + $0x168] sm:$0xff]  ;;  %v180_v6 = vld [vmem:[#allocation2 + $0x178] sm:$0xff]  ;;  %v493_v7 = vpack.c.bf16 %v175_v4, %v173_v3  ;;  %v177_v9 = vld [vmem:[#allocation2 + $0x160] sm:$0xff] }
  0x24   :  { %466 = vmatpush1.bf16.msra.mxu1 %v465_v29  ;;  %v495_v8 = vpack.c.bf16 %v180_v6, %v178_v5  ;;  %v179_v10 = vld [vmem:[#allocation2 + $0x170] sm:$0xff]  ;;  %v182_v11 = vld [vmem:[#allocation2 + $0x188] sm:$0xff]  ;;  %v184_v12 = vld [vmem:[#allocation2 + $0x198] sm:$0xff] }
  0x25   :  { %468 = vmatprep.subr.bf16.mxu1 %v467_v30  ;;  %v497_v13 = vpack.c.bf16 %v179_v10, %v177_v9  ;;  %v499_v14 = vpack.c.bf16 %v184_v12, %v182_v11  ;;  %v181_v15 = vld [vmem:[#allocation2 + $0x180] sm:$0xff]  ;;  %v183_v16 = vld [vmem:[#allocation2 + $0x190] sm:$0xff]  ;;  %v186_v17 = vld [vmem:[#allocation2 + $0x1a8] sm:$0xff]  ;;  %v46_v11 = vlaneseq }
  0x26   :  { %v188_v18 = vld [vmem:[#allocation2 + $0x1b8] sm:$0xff]  ;;  %v501_v19 = vpack.c.bf16 %v183_v16, %v181_v15  ;;  %v185_v21 = vld [vmem:[#allocation2 + $0x1a0] sm:$0xff]  ;;  %v187_v22 = vld [vmem:[#allocation2 + $0x1b0] sm:$0xff] }
  0x27   :  { %v503_v20 = vpack.c.bf16 %v188_v18, %v186_v17  ;;  %v190_v23 = vld [vmem:[#allocation2 + $0x1c8] sm:$0xff]  ;;  %v192_v24 = vld [vmem:[#allocation2 + $0x1d8] sm:$0xff]  ;;  %v505_v25 = vpack.c.bf16 %v187_v22, %v185_v21  ;;  %v189_v27 = vld [vmem:[#allocation2 + $0x1c0] sm:$0xff]  ;;  %v47_v12 = vshrl.u32 %v46_v11, 7 }
  0x28   :  { %470 = vmatpush1.bf16.msra.mxu1 %v469_v35  ;;  %v507_v26 = vpack.c.bf16 %v192_v24, %v190_v23  ;;  %v191_v28 = vld [vmem:[#allocation2 + $0x1d0] sm:$0xff]  ;;  %v194_v30 = vld [vmem:[#allocation2 + $0x1e8] sm:$0xff]  ;;  %v196_v31 = vld [vmem:[#allocation2 + $0x1f8] sm:$0xff] }
  0x29   :  { %472 = vmatprep.subr.bf16.mxu1 %v471_v36  ;;  %v509_v29 = vpack.c.bf16 %v191_v28, %v189_v27  ;;  %v511_v32 = vpack.c.bf16 %v196_v31, %v194_v30  ;;  %v193_v33 = vld [vmem:[#allocation2 + $0x1e0] sm:$0xff]  ;;  %v195_v34 = vld [vmem:[#allocation2 + $0x1f0] sm:$0xff]  ;;  %v299_v37 = vld [vmem:[%s788_s5 + $0x88] sm:$0xff]  ;;  %v52_v15 = vsub.s32 1, %v47_v12 }
  0x2a   :  { %v513_v35 = vpack.c.bf16 %v195_v34, %v193_v33  ;;  %v298_v36 = vld [vmem:[%s788_s5 + $0x80] sm:$0xff]  ;;  %v283_v40 = vld [vmem:[%s788_s5 + $0x8] sm:$0xff]  ;;  %v284_v45 = vld [vmem:[%s788_s5 + $0x10] sm:$0xff] }
  0x2b   :  { %v282_v38 = vld [vmem:[%s788_s5] sm:$0xff]  ;;  %v515_v39 = vpack.c.bf16 %v299_v37, %v298_v36  ;;  %v285_v46 = vld [vmem:[%s788_s5 + $0x18] sm:$0xff]  ;;  %v287_v52 = vld [vmem:[%s788_s5 + $0x28] sm:$0xff] }
  0x2c   :  { %474 = vmatpush1.bf16.msra.mxu1 %v473_v41  ;;  %v300_v41 = vld [vmem:[%s788_s5 + $0x90] sm:$0xff]  ;;  %v517_v43 = vpack.c.bf16 %v283_v40, %v282_v38  ;;  %v521_v49 = vpack.c.bf16 %v285_v46, %v284_v45  ;;  %v286_v51 = vld [vmem:[%s788_s5 + $0x20] sm:$0xff]  ;;  %v289_v58 = vld [vmem:[%s788_s5 + $0x38] sm:$0xff]  ;;  %v392_v46 = vand.u32 127, %v46_v11 }
  0x2d   :  { %476 = vmatprep.subr.bf16.mxu1 %v475_v42  ;;  %v301_v42 = vld [vmem:[%s788_s5 + $0x98] sm:$0xff]  ;;  %516 = vmatprep.subr.bf16.mxu0 %v515_v39  ;;  %v525_v55 = vpack.c.bf16 %v287_v52, %v286_v51  ;;  %v288_v57 = vld [vmem:[%s788_s5 + $0x30] sm:$0xff]  ;;  %v290_v63 = vld [vmem:[%s788_s5 + $0x40] sm:$0xff] }
  0x2e   :  { %v519_v44 = vpack.c.bf16 %v301_v42, %v300_v41  ;;  %518 = vmatpush3.bf16.msra.mxu0 %v517_v43  ;;  %v529_v61 = vpack.c.bf16 %v289_v58, %v288_v57  ;;  %v291_v0 = vld [vmem:[%s788_s5 + $0x48] sm:$0xff]  ;;  %v292_v5 = vld [vmem:[%s788_s5 + $0x50] sm:$0xff]  ;;  %v293_v6 = vld [vmem:[%s788_s5 + $0x58] sm:$0xff]  ;;  %vm395_vm1 = vcmp.lt.s32.totalorder %v392_v46, 4 }
  0x2f   :  { %v533_v3 = vpack.c.bf16 %v291_v0, %v290_v63  ;;  %v537_v9 = vpack.c.bf16 %v293_v6, %v292_v5  ;;  %v294_v24 = vld [vmem:[%s788_s5 + $0x60] sm:$0xff]  ;;  %v312_v27 = vld [vmem:[%s788_s5 + $0xf0] sm:$0xff]  ;;  %v313_v28 = vld [vmem:[%s788_s5 + $0xf8] sm:$0xff] }
  0x30   :  { %478 = vmatpush1.bf16.msra.mxu1 %v477_v47  ;;  %v302_v47 = vld [vmem:[%s788_s5 + $0xa0] sm:$0xff]  ;;  %520 = vmatprep.subr.bf16.mxu0 %v519_v44  ;;  %v296_v30 = vld [vmem:[%s788_s5 + $0x70] sm:$0xff]  ;;  %v297_v31 = vld [vmem:[%s788_s5 + $0x78] sm:$0xff] }
  0x31   :  { %480 = vmatprep.subr.bf16.mxu1 %v479_v48  ;;  %v303_v48 = vld [vmem:[%s788_s5 + $0xa8] sm:$0xff]  ;;  %v197_v33 = vld [vmem:[%s787_s4] sm:$0x3]  ;;  %s604_s4 = smov [#allocation5]  }
  0x32   :  { %v523_v50 = vpack.c.bf16 %v303_v48, %v302_v47  ;;  %522 = vmatpush3.bf16.msra.mxu0 %v521_v49  ;;  %v415_v43 = vld [vmem:[%s789_s6] ss:$0 sm:$0xff]  ;;  %s405_s11 = sshll.u32 %s604_s4, 4  ;;  %s406_s11 = int_to_ptr.vmem [resolvable:$true] %s405_s11 }
  0x33   :  { %s574_s12 = scalar_lea.vmem %s406_s11, 64  ;;  %p579_p9 = scmp.lt.s32.totalorder %s406_s11, %s406_s11 }
  0x34   :  { %482 = vmatpush1.bf16.msra.mxu1 %v481_v53  ;;  %v304_v53 = vld [vmem:[%s788_s5 + $0xb0] sm:$0xff]  ;;  %524 = vmatprep.subr.bf16.mxu0 %v523_v50  ;;  %p575_p8 = scmp.ne.s32.totalorder %s406_s11, %s574_s12  ;;  %p580_p10 = scmp.lt.s32.totalorder %s574_s12, %s574_s12 }
  0x35   :  { %484 = vmatprep.subr.bf16.mxu1 %v483_v54  ;;  %v305_v54 = vld [vmem:[%s788_s5 + $0xb8] sm:$0xff] }
  0x36   :  { %v527_v56 = vpack.c.bf16 %v305_v54, %v304_v53  ;;  %526 = vmatpush3.bf16.msra.mxu0 %v525_v55  ;;  %p581_p11 = por %p580_p10, %p579_p9 }
  0x38   :  { %486 = vmatpush1.bf16.msra.mxu1 %v485_v59  ;;  %v306_v59 = vld [vmem:[%s788_s5 + $0xc0] sm:$0xff]  ;;  %528 = vmatprep.subr.bf16.mxu0 %v527_v56  ;;  %p582_p12 = pnand %p581_p11, %p575_p8 }
  0x39   :  { %488 = vmatprep.subr.bf16.mxu1 %v487_v60  ;;  %v307_v60 = vld [vmem:[%s788_s5 + $0xc8] sm:$0xff] }
  0x3a   :  { %v531_v62 = vpack.c.bf16 %v307_v60, %v306_v59  ;;  %530 = vmatpush3.bf16.msra.mxu0 %v529_v61 }
  0x3c   :  { %490 = vmatpush1.bf16.msra.mxu1 %v489_v1  ;;  %v308_v1 = vld [vmem:[%s788_s5 + $0xd0] sm:$0xff]  ;;  %532 = vmatprep.subr.bf16.mxu0 %v531_v62 }
  0x3d   :  { %492 = vmatprep.subr.bf16.mxu1 %v491_v2  ;;  %v309_v2 = vld [vmem:[%s788_s5 + $0xd8] sm:$0xff] }
  0x3e   :  { %v535_v4 = vpack.c.bf16 %v309_v2, %v308_v1  ;;  %534 = vmatpush3.bf16.msra.mxu0 %v533_v3 }
  0x40   :  { %494 = vmatpush1.bf16.msra.mxu1 %v493_v7  ;;  %v310_v7 = vld [vmem:[%s788_s5 + $0xe0] sm:$0xff]  ;;  %536 = vmatprep.subr.bf16.mxu0 %v535_v4 }
  0x41   :  { %496 = vmatprep.subr.bf16.mxu1 %v495_v8  ;;  %v311_v8 = vld [vmem:[%s788_s5 + $0xe8] sm:$0xff] }
  0x42   :  { %v539_v10 = vpack.c.bf16 %v311_v8, %v310_v7  ;;  %538 = vmatpush3.bf16.msra.mxu0 %v537_v9 }
  0x44   :  { %498 = vmatpush1.bf16.msra.mxu1 %v497_v13  ;;  %540 = vmatprep.subr.bf16.mxu0 %v539_v10  ;;  %v48_v13 = vsub.s32 0, %v47_v12 }
  0x45   :  { %500 = vmatprep.subr.bf16.mxu1 %v499_v14  ;;  %v44_v14 = vld [vmem:[%s785_s2] sm:$0x3] }
  0x46   :  { %v49_v16 = vrot.slane %v44_v14, %v48_v13  ;;  %v53_v17 = vrot.slane %v44_v14, %v52_v15  ;;  %v202_v34 = vrot.slane %v197_v33, %v48_v13 }
  0x48   :  { %502 = vmatpush1.bf16.msra.mxu1 %v501_v19 }
  0x49   :  { %504 = vmatprep.subr.bf16.mxu1 %v503_v20 }
  0x4c   :  { %506 = vmatpush1.bf16.msra.mxu1 %v505_v25  ;;  %v295_v25 = vld [vmem:[%s788_s5 + $0x68] sm:$0xff] }
  0x4d   :  { %508 = vmatprep.subr.bf16.mxu1 %v507_v26  ;;  %v541_v26 = vpack.c.bf16 %v295_v25, %v294_v24 }
  0x4f   :  { %542 = vmatpush3.bf16.msra.mxu0 %v541_v26 }
  0x50   :  { %510 = vmatpush1.bf16.msra.mxu1 %v509_v29  ;;  %v543_v29 = vpack.c.bf16 %v313_v28, %v312_v27 }
  0x51   :  { %512 = vmatprep.subr.bf16.mxu1 %v511_v32  ;;  %v545_v32 = vpack.c.bf16 %v297_v31, %v296_v30 }
  0x52   :  { %544 = vmatprep.subr.bf16.mxu0 %v543_v29 }
  0x53   :  { %546 = vmatpush3.bf16.msra.mxu0 %v545_v32 }
  0x54   :  { %514 = vmatpush1.bf16.msra.mxu1 %v513_v35  ;;  %v206_v35 = vrot.slane %v197_v33, %v52_v15 }
  0xe9   :  { %v126_v18 = vpop.f32.mrb[0].mxu0 }
  0xea   :  { %v127_v19 = vadd.f32 %v126_v18, %v49_v16  ;;  %v128_v20 = vpop.f32.mrb[1].mxu0 }
  0xeb   :  { %v129_v21 = vadd.f32 %v128_v20, %v53_v17 }
  0xec   :  { %v131_v23 = vmax.f32 %v127_v19, 0.0 }
  0xed   :  { %v132_v22 = vmax.f32 %v129_v21, 0.0 }
  0xef   :  { %273 = vmatprep.mubr.f32.mxu1 %v132_v22 }
  0xf0   :  { %274 = vmatmul.mubr.f32.vlgmr.msra.gmra.mrb[0].mxu1 %v131_v23 }
 0x1c3   :  { %v275_v36 = vpop.f32.mrb[0].mxu1 }
 0x1c4   :  { %v276_v37 = vadd.f32 %v275_v36, %v202_v34  ;;  %v277_v38 = vpop.f32.mrb[1].mxu1 }
 0x1c5   :  { %v278_v39 = vadd.f32 %v277_v38, %v206_v35 }
 0x1c6   :  { %v280_v41 = vmax.f32 %v276_v37, 0.0 }
 0x1c7   :  { %v281_v40 = vmax.f32 %v278_v39, 0.0 }
 0x1c9   :  { %385 = vmatprep.mubr.f32.mxu0 %v281_v40 }
 0x1ca   :  { %386 = vmatmul.mubr.f32.vlgmr.msra.gmra.mrb[2].mxu0 %v280_v41 }
 0x29d   :  { %v448_v42 = vpop.f32.mrb[2].mxu0 }
 0x29e   :  { %v449_v44 = vpop.f32.mrb[3].mxu0 }
 0x29f   :  { %v450_v45 = vadd.f32 %v449_v44, %v448_v42 }
 0x2a1   :  { %v388_v47 = vadd.f32 %v450_v45, %v415_v43 }
 0x2a3   :  { %v393_v48 = vmax.f32 %v388_v47, -20.0 }
 0x2a5   :  { %v394_v49 = vmin.f32 %v393_v48, 2.0 }
 0x2a7   :  { %v396_v50 = vsel %vm395_vm1, %v388_v47, %v394_v49 }
 0x2a8   :  { %398 = vst.msk [vmem:[#allocation5] sm:$0xf] %vm397_vm2, %v396_v50 }
 0x2a9   :  { %585 = shalt.err (!%p582_p12)
}
 0x2aa   :  { %s586_s14 = scalar_lea.hbm %s790_s7, 64 }
 0x2ab   :  { %p587_p13 = scmp.ne.s32.totalorder %s790_s7, %s586_s14  ;;  %p590_p0 = scmp.lt.u32.totalorder %s586_s14, %s790_s7 }
 0x2ad   :  { %p592_p1 = pnand %p590_p0, %p587_p13 }
 0x2af   :  { %595 = shalt.err (!%p592_p1)
}
 0x2b0   :  { %408 = dma.vmem_to_hbm [thread:$0]  %s406_s11, 64, %s790_s7, [#allocation4]  }
 0x2b1   :  { %598 = dma.done.wait [#allocation4], 64  }
 0x2b2   :  { %599 = vsyncadd [#allocation4], 4294967232 }
 0x2b3   :  { %412 = vsyncpa [#allocation3], 1 }
 0x2b4   :  { %413 = vsyncpa [#allocation4], 1 }

// kernel: tpu_custom_call.1
= control target key start
LH: loop header
LB: loop body
LE: loop exit
PB: predicated region body
PF: predicated region fallthrough
CT: control target
= control target key end

     0   :  { %12 = vsyncpa [#allocation3], 0  ;;  %s783_s0 = inlined_call_operand.vmem [shape: f32[4,8], index: 0, kind: input, shape index: {}]   ;;  %s784_s1 = inlined_call_operand.vmem [shape: f32[8,256], index: 1, kind: input, shape index: {}]   ;;  %s785_s2 = inlined_call_operand.vmem [shape: f32[1,256], index: 2, kind: input, shape index: {}]   ;;  %s786_s3 = inlined_call_operand.hbm [shape: f32[256,256], index: 3, kind: input, shape index: {}]   ;;  %s787_s4 = inlined_call_operand.vmem [shape: f32[1,256], index: 4, kind: input, shape index: {}]   ;;  %s788_s5 = inlined_call_operand.vmem [shape: f32[256,8], index: 5, kind: input, shape index: {}]   ;;  %s789_s6 = inlined_call_operand.vmem [shape: f32[1,8], index: 6, kind: input, shape index: {}]   ;;  %s790_s7 = inlined_call_operand.hbm [shape: f32[4,8], index: 7, kind: output, shape index: {}]  }
   0x1   :  { %13 = vsyncpa [#allocation4], 0  ;;  %s600_s24 = smov [#allocation2]   ;;  %s552_s28 = scalar_lea.hbm %s786_s3, 8192 }
   0x2   :  { %s25_s25 = sshll.u32 %s600_s24, 4  ;;  %p553_p0 = scmp.ne.s32.totalorder %s786_s3, %s552_s28  ;;  %s26_s25 = int_to_ptr.vmem [resolvable:$true] %s25_s25 }
   0x3   :  { %p556_p1 = scmp.lt.u32.totalorder %s552_s28, %s786_s3 }
   0x5   :  { %p558_p2 = pnand %p556_p1, %p553_p0 }
   0x7   :  { %561 = shalt.err (!%p558_p2)
}
   0x8   :  { %s562_s10 = scalar_lea.vmem %s26_s25, 8192  ;;  %p567_p4 = scmp.lt.s32.totalorder %s26_s25, %s26_s25 }
   0x9   :  { %p563_p3 = scmp.ne.s32.totalorder %s26_s25, %s562_s10  ;;  %p568_p5 = scmp.lt.s32.totalorder %s562_s10, %s562_s10 }
   0xb   :  { %p569_p6 = por %p568_p5, %p567_p4 }
   0xd   :  { %p570_p7 = pnand %p569_p6, %p563_p3 }
   0xf   :  { %573 = shalt.err (!%p570_p7)
}
  0x10   :  { %s601_s11 = smov 256   ;;  %s602_s12 = smov 16  }
  0x11   :  { %31 = dma.hbm_to_vmem [thread:$0]  %s786_s3, 8192, %s26_s25, [#allocation3], %s601_s11, %s601_s11, %s602_s12  }
  0x12   :  { %596 = dma.done.wait [#allocation3], 8192  }
  0x13   :  { %597 = vsyncadd [#allocation3], 4294959104  ;;  %v603_v0 = vmov 0.0   ;;  %v43_v1 = vld [vmem:[%s784_s1 + $0x8] sm:$0xff]  ;;  %v42_v2 = vld [vmem:[%s784_s1] sm:$0xff]  ;;  %vm56_vm0 = vcmask 64512  }
  0x14   :  { %124 = vmatprep.mubr.f32.mxu0 %v603_v0  ;;  %v41_v3 = vld [vmem:[%s783_s0] sm:$0xf]  ;;  %60 = vmatprep.subr.mxu0 %v43_v1  ;;  %v134_v4 = vld [vmem:[#allocation2 + $0x8] sm:$0xff]  ;;  %v136_v5 = vld [vmem:[#allocation2 + $0x18] sm:$0xff]  ;;  %vm397_vm2 = vcmask 60416  }
  0x15   :  { %v133_v6 = vld [vmem:[#allocation2] sm:$0xff]  ;;  %61 = vmatpush1.msra.mxu0 %v42_v2  ;;  %v451_v7 = vpack.c.bf16 %v136_v5, %v134_v4  ;;  %v135_v8 = vld [vmem:[#allocation2 + $0x10] sm:$0xff]  ;;  %v138_v9 = vld [vmem:[#allocation2 + $0x28] sm:$0xff] }
  0x16   :  { %v140_v10 = vld [vmem:[#allocation2 + $0x38] sm:$0xff]  ;;  %414 = vmatmul.mubr.msk.f32.vlgmr.msra.gmra.mrb[0].mxu0 %vm56_vm0, %v41_v3  ;;  %v453_v11 = vpack.c.bf16 %v135_v8, %v133_v6  ;;  %v137_v13 = vld [vmem:[#allocation2 + $0x20] sm:$0xff]  ;;  %v139_v14 = vld [vmem:[#allocation2 + $0x30] sm:$0xff] }
  0x17   :  { %v455_v12 = vpack.c.bf16 %v140_v10, %v138_v9  ;;  %v142_v15 = vld [vmem:[#allocation2 + $0x48] sm:$0xff]  ;;  %452 = vmatprep.subr.bf16.mxu1 %v451_v7  ;;  %v144_v16 = vld [vmem:[#allocation2 + $0x58] sm:$0xff]  ;;  %v457_v17 = vpack.c.bf16 %v139_v14, %v137_v13  ;;  %v141_v19 = vld [vmem:[#allocation2 + $0x40] sm:$0xff] }
  0x18   :  { %454 = vmatpush1.bf16.msra.mxu1 %v453_v11  ;;  %v459_v18 = vpack.c.bf16 %v144_v16, %v142_v15  ;;  %v143_v20 = vld [vmem:[#allocation2 + $0x50] sm:$0xff]  ;;  %v146_v21 = vld [vmem:[#allocation2 + $0x68] sm:$0xff]  ;;  %v148_v22 = vld [vmem:[#allocation2 + $0x78] sm:$0xff] }
  0x19   :  { %456 = vmatprep.subr.bf16.mxu1 %v455_v12  ;;  %v461_v23 = vpack.c.bf16 %v143_v20, %v141_v19  ;;  %v463_v24 = vpack.c.bf16 %v148_v22, %v146_v21  ;;  %v145_v25 = vld [vmem:[#allocation2 + $0x60] sm:$0xff]  ;;  %v147_v26 = vld [vmem:[#allocation2 + $0x70] sm:$0xff]  ;;  %v150_v27 = vld [vmem:[#allocation2 + $0x88] sm:$0xff] }
  0x1a   :  { %v152_v28 = vld [vmem:[#allocation2 + $0x98] sm:$0xff]  ;;  %v465_v29 = vpack.c.bf16 %v147_v26, %v145_v25  ;;  %v149_v31 = vld [vmem:[#allocation2 + $0x80] sm:$0xff]  ;;  %v151_v32 = vld [vmem:[#allocation2 + $0x90] sm:$0xff] }
  0x1b   :  { %v467_v30 = vpack.c.bf16 %v152_v28, %v150_v27  ;;  %v154_v33 = vld [vmem:[#allocation2 + $0xa8] sm:$0xff]  ;;  %v156_v34 = vld [vmem:[#allocation2 + $0xb8] sm:$0xff]  ;;  %v469_v35 = vpack.c.bf16 %v151_v32, %v149_v31  ;;  %v153_v37 = vld [vmem:[#allocation2 + $0xa0] sm:$0xff] }
  0x1c   :  { %458 = vmatpush1.bf16.msra.mxu1 %v457_v17  ;;  %v471_v36 = vpack.c.bf16 %v156_v34, %v154_v33  ;;  %v155_v38 = vld [vmem:[#allocation2 + $0xb0] sm:$0xff]  ;;  %v158_v39 = vld [vmem:[#allocation2 + $0xc8] sm:$0xff]  ;;  %v160_v40 = vld [vmem:[#allocation2 + $0xd8] sm:$0xff] }
  0x1d   :  { %460 = vmatprep.subr.bf16.mxu1 %v459_v18  ;;  %v473_v41 = vpack.c.bf16 %v155_v38, %v153_v37  ;;  %v475_v42 = vpack.c.bf16 %v160_v40, %v158_v39  ;;  %v157_v43 = vld [vmem:[#allocation2 + $0xc0] sm:$0xff]  ;;  %v159_v44 = vld [vmem:[#allocation2 + $0xd0] sm:$0xff]  ;;  %v162_v45 = vld [vmem:[#allocation2 + $0xe8] sm:$0xff] }
  0x1e   :  { %v164_v46 = vld [vmem:[#allocation2 + $0xf8] sm:$0xff]  ;;  %v477_v47 = vpack.c.bf16 %v159_v44, %v157_v43  ;;  %v161_v49 = vld [vmem:[#allocation2 + $0xe0] sm:$0xff]  ;;  %v163_v50 = vld [vmem:[#allocation2 + $0xf0] sm:$0xff] }
  0x1f   :  { %v479_v48 = vpack.c.bf16 %v164_v46, %v162_v45  ;;  %v166_v51 = vld [vmem:[#allocation2 + $0x108] sm:$0xff]  ;;  %v168_v52 = vld [vmem:[#allocation2 + $0x118] sm:$0xff]  ;;  %v481_v53 = vpack.c.bf16 %v163_v50, %v161_v49  ;;  %v165_v55 = vld [vmem:[#allocation2 + $0x100] sm:$0xff] }
  0x20   :  { %462 = vmatpush1.bf16.msra.mxu1 %v461_v23  ;;  %v483_v54 = vpack.c.bf16 %v168_v52, %v166_v51  ;;  %v167_v56 = vld [vmem:[#allocation2 + $0x110] sm:$0xff]  ;;  %v170_v57 = vld [vmem:[#allocation2 + $0x128] sm:$0xff]  ;;  %v172_v58 = vld [vmem:[#allocation2 + $0x138] sm:$0xff] }
  0x21   :  { %464 = vmatprep.subr.bf16.mxu1 %v463_v24  ;;  %v485_v59 = vpack.c.bf16 %v167_v56, %v165_v55  ;;  %v487_v60 = vpack.c.bf16 %v172_v58, %v170_v57  ;;  %v169_v61 = vld [vmem:[#allocation2 + $0x120] sm:$0xff]  ;;  %v171_v62 = vld [vmem:[#allocation2 + $0x130] sm:$0xff]  ;;  %v174_v63 = vld [vmem:[#allocation2 + $0x148] sm:$0xff] }
  0x22   :  { %v176_v0 = vld [vmem:[#allocation2 + $0x158] sm:$0xff]  ;;  %v489_v1 = vpack.c.bf16 %v171_v62, %v169_v61  ;;  %v173_v3 = vld [vmem:[#allocation2 + $0x140] sm:$0xff]  ;;  %v175_v4 = vld [vmem:[#allocation2 + $0x150] sm:$0xff] }
  0x23   :  { %v491_v2 = vpack.c.bf16 %v176_v0, %v174_v63  ;;  %v178_v5 = vld [vmem:[#allocation2 + $0x168] sm:$0xff]  ;;  %v180_v6 = vld [vmem:[#allocation2 + $0x178] sm:$0xff]  ;;  %v493_v7 = vpack.c.bf16 %v175_v4, %v173_v3  ;;  %v177_v9 = vld [vmem:[#allocation2 + $0x160] sm:$0xff] }
  0x24   :  { %466 = vmatpush1.bf16.msra.mxu1 %v465_v29  ;;  %v495_v8 = vpack.c.bf16 %v180_v6, %v178_v5  ;;  %v179_v10 = vld [vmem:[#allocation2 + $0x170] sm:$0xff]  ;;  %v182_v11 = vld [vmem:[#allocation2 + $0x188] sm:$0xff]  ;;  %v184_v12 = vld [vmem:[#allocation2 + $0x198] sm:$0xff] }
  0x25   :  { %468 = vmatprep.subr.bf16.mxu1 %v467_v30  ;;  %v497_v13 = vpack.c.bf16 %v179_v10, %v177_v9  ;;  %v499_v14 = vpack.c.bf16 %v184_v12, %v182_v11  ;;  %v181_v15 = vld [vmem:[#allocation2 + $0x180] sm:$0xff]  ;;  %v183_v16 = vld [vmem:[#allocation2 + $0x190] sm:$0xff]  ;;  %v186_v17 = vld [vmem:[#allocation2 + $0x1a8] sm:$0xff]  ;;  %v46_v11 = vlaneseq }
  0x26   :  { %v188_v18 = vld [vmem:[#allocation2 + $0x1b8] sm:$0xff]  ;;  %v501_v19 = vpack.c.bf16 %v183_v16, %v181_v15  ;;  %v185_v21 = vld [vmem:[#allocation2 + $0x1a0] sm:$0xff]  ;;  %v187_v22 = vld [vmem:[#allocation2 + $0x1b0] sm:$0xff] }
  0x27   :  { %v503_v20 = vpack.c.bf16 %v188_v18, %v186_v17  ;;  %v190_v23 = vld [vmem:[#allocation2 + $0x1c8] sm:$0xff]  ;;  %v192_v24 = vld [vmem:[#allocation2 + $0x1d8] sm:$0xff]  ;;  %v505_v25 = vpack.c.bf16 %v187_v22, %v185_v21  ;;  %v189_v27 = vld [vmem:[#allocation2 + $0x1c0] sm:$0xff]  ;;  %v47_v12 = vshrl.u32 %v46_v11, 7 }
  0x28   :  { %470 = vmatpush1.bf16.msra.mxu1 %v469_v35  ;;  %v507_v26 = vpack.c.bf16 %v192_v24, %v190_v23  ;;  %v191_v28 = vld [vmem:[#allocation2 + $0x1d0] sm:$0xff]  ;;  %v194_v30 = vld [vmem:[#allocation2 + $0x1e8] sm:$0xff]  ;;  %v196_v31 = vld [vmem:[#allocation2 + $0x1f8] sm:$0xff] }
  0x29   :  { %472 = vmatprep.subr.bf16.mxu1 %v471_v36  ;;  %v509_v29 = vpack.c.bf16 %v191_v28, %v189_v27  ;;  %v511_v32 = vpack.c.bf16 %v196_v31, %v194_v30  ;;  %v193_v33 = vld [vmem:[#allocation2 + $0x1e0] sm:$0xff]  ;;  %v195_v34 = vld [vmem:[#allocation2 + $0x1f0] sm:$0xff]  ;;  %v299_v37 = vld [vmem:[%s788_s5 + $0x88] sm:$0xff]  ;;  %v52_v15 = vsub.s32 1, %v47_v12 }
  0x2a   :  { %v513_v35 = vpack.c.bf16 %v195_v34, %v193_v33  ;;  %v298_v36 = vld [vmem:[%s788_s5 + $0x80] sm:$0xff]  ;;  %v283_v40 = vld [vmem:[%s788_s5 + $0x8] sm:$0xff]  ;;  %v284_v45 = vld [vmem:[%s788_s5 + $0x10] sm:$0xff] }
  0x2b   :  { %v282_v38 = vld [vmem:[%s788_s5] sm:$0xff]  ;;  %v515_v39 = vpack.c.bf16 %v299_v37, %v298_v36  ;;  %v285_v46 = vld [vmem:[%s788_s5 + $0x18] sm:$0xff]  ;;  %v287_v52 = vld [vmem:[%s788_s5 + $0x28] sm:$0xff] }
  0x2c   :  { %474 = vmatpush1.bf16.msra.mxu1 %v473_v41  ;;  %v300_v41 = vld [vmem:[%s788_s5 + $0x90] sm:$0xff]  ;;  %v517_v43 = vpack.c.bf16 %v283_v40, %v282_v38  ;;  %v521_v49 = vpack.c.bf16 %v285_v46, %v284_v45  ;;  %v286_v51 = vld [vmem:[%s788_s5 + $0x20] sm:$0xff]  ;;  %v289_v58 = vld [vmem:[%s788_s5 + $0x38] sm:$0xff]  ;;  %v392_v46 = vand.u32 127, %v46_v11 }
  0x2d   :  { %476 = vmatprep.subr.bf16.mxu1 %v475_v42  ;;  %v301_v42 = vld [vmem:[%s788_s5 + $0x98] sm:$0xff]  ;;  %516 = vmatprep.subr.bf16.mxu0 %v515_v39  ;;  %v525_v55 = vpack.c.bf16 %v287_v52, %v286_v51  ;;  %v288_v57 = vld [vmem:[%s788_s5 + $0x30] sm:$0xff]  ;;  %v290_v63 = vld [vmem:[%s788_s5 + $0x40] sm:$0xff] }
  0x2e   :  { %v519_v44 = vpack.c.bf16 %v301_v42, %v300_v41  ;;  %518 = vmatpush3.bf16.msra.mxu0 %v517_v43  ;;  %v529_v61 = vpack.c.bf16 %v289_v58, %v288_v57  ;;  %v291_v0 = vld [vmem:[%s788_s5 + $0x48] sm:$0xff]  ;;  %v292_v5 = vld [vmem:[%s788_s5 + $0x50] sm:$0xff]  ;;  %v293_v6 = vld [vmem:[%s788_s5 + $0x58] sm:$0xff]  ;;  %vm395_vm1 = vcmp.lt.s32.totalorder %v392_v46, 4 }
  0x2f   :  { %v533_v3 = vpack.c.bf16 %v291_v0, %v290_v63  ;;  %v537_v9 = vpack.c.bf16 %v293_v6, %v292_v5  ;;  %v294_v24 = vld [vmem:[%s788_s5 + $0x60] sm:$0xff]  ;;  %v312_v27 = vld [vmem:[%s788_s5 + $0xf0] sm:$0xff]  ;;  %v313_v28 = vld [vmem:[%s788_s5 + $0xf8] sm:$0xff] }
  0x30   :  { %478 = vmatpush1.bf16.msra.mxu1 %v477_v47  ;;  %v302_v47 = vld [vmem:[%s788_s5 + $0xa0] sm:$0xff]  ;;  %520 = vmatprep.subr.bf16.mxu0 %v519_v44  ;;  %v296_v30 = vld [vmem:[%s788_s5 + $0x70] sm:$0xff]  ;;  %v297_v31 = vld [vmem:[%s788_s5 + $0x78] sm:$0xff] }
  0x31   :  { %480 = vmatprep.subr.bf16.mxu1 %v479_v48  ;;  %v303_v48 = vld [vmem:[%s788_s5 + $0xa8] sm:$0xff]  ;;  %v197_v33 = vld [vmem:[%s787_s4] sm:$0x3]  ;;  %s604_s4 = smov [#allocation5]  }
  0x32   :  { %v523_v50 = vpack.c.bf16 %v303_v48, %v302_v47  ;;  %522 = vmatpush3.bf16.msra.mxu0 %v521_v49  ;;  %v415_v43 = vld [vmem:[%s789_s6] ss:$0 sm:$0xff]  ;;  %s405_s11 = sshll.u32 %s604_s4, 4  ;;  %s406_s11 = int_to_ptr.vmem [resolvable:$true] %s405_s11 }
  0x33   :  { %s574_s12 = scalar_lea.vmem %s406_s11, 64  ;;  %p579_p9 = scmp.lt.s32.totalorder %s406_s11, %s406_s11 }
  0x34   :  { %482 = vmatpush1.bf16.msra.mxu1 %v481_v53  ;;  %v304_v53 = vld [vmem:[%s788_s5 + $0xb0] sm:$0xff]  ;;  %524 = vmatprep.subr.bf16.mxu0 %v523_v50  ;;  %p575_p8 = scmp.ne.s32.totalorder %s406_s11, %s574_s12  ;;  %p580_p10 = scmp.lt.s32.totalorder %s574_s12, %s574_s12 }
  0x35   :  { %484 = vmatprep.subr.bf16.mxu1 %v483_v54  ;;  %v305_v54 = vld [vmem:[%s788_s5 + $0xb8] sm:$0xff] }
  0x36   :  { %v527_v56 = vpack.c.bf16 %v305_v54, %v304_v53  ;;  %526 = vmatpush3.bf16.msra.mxu0 %v525_v55  ;;  %p581_p11 = por %p580_p10, %p579_p9 }
  0x38   :  { %486 = vmatpush1.bf16.msra.mxu1 %v485_v59  ;;  %v306_v59 = vld [vmem:[%s788_s5 + $0xc0] sm:$0xff]  ;;  %528 = vmatprep.subr.bf16.mxu0 %v527_v56  ;;  %p582_p12 = pnand %p581_p11, %p575_p8 }
  0x39   :  { %488 = vmatprep.subr.bf16.mxu1 %v487_v60  ;;  %v307_v60 = vld [vmem:[%s788_s5 + $0xc8] sm:$0xff] }
  0x3a   :  { %v531_v62 = vpack.c.bf16 %v307_v60, %v306_v59  ;;  %530 = vmatpush3.bf16.msra.mxu0 %v529_v61 }
  0x3c   :  { %490 = vmatpush1.bf16.msra.mxu1 %v489_v1  ;;  %v308_v1 = vld [vmem:[%s788_s5 + $0xd0] sm:$0xff]  ;;  %532 = vmatprep.subr.bf16.mxu0 %v531_v62 }
  0x3d   :  { %492 = vmatprep.subr.bf16.mxu1 %v491_v2  ;;  %v309_v2 = vld [vmem:[%s788_s5 + $0xd8] sm:$0xff] }
  0x3e   :  { %v535_v4 = vpack.c.bf16 %v309_v2, %v308_v1  ;;  %534 = vmatpush3.bf16.msra.mxu0 %v533_v3 }
  0x40   :  { %494 = vmatpush1.bf16.msra.mxu1 %v493_v7  ;;  %v310_v7 = vld [vmem:[%s788_s5 + $0xe0] sm:$0xff]  ;;  %536 = vmatprep.subr.bf16.mxu0 %v535_v4 }
  0x41   :  { %496 = vmatprep.subr.bf16.mxu1 %v495_v8  ;;  %v311_v8 = vld [vmem:[%s788_s5 + $0xe8] sm:$0xff] }
  0x42   :  { %v539_v10 = vpack.c.bf16 %v311_v8, %v310_v7  ;;  %538 = vmatpush3.bf16.msra.mxu0 %v537_v9 }
  0x44   :  { %498 = vmatpush1.bf16.msra.mxu1 %v497_v13  ;;  %540 = vmatprep.subr.bf16.mxu0 %v539_v10  ;;  %v48_v13 = vsub.s32 0, %v47_v12 }
  0x45   :  { %500 = vmatprep.subr.bf16.mxu1 %v499_v14  ;;  %v44_v14 = vld [vmem:[%s785_s2] sm:$0x3] }
  0x46   :  { %v49_v16 = vrot.slane %v44_v14, %v48_v13  ;;  %v53_v17 = vrot.slane %v44_v14, %v52_v15  ;;  %v202_v34 = vrot.slane %v197_v33, %v48_v13 }
  0x48   :  { %502 = vmatpush1.bf16.msra.mxu1 %v501_v19 }
  0x49   :  { %504 = vmatprep.subr.bf16.mxu1 %v503_v20 }
  0x4c   :  { %506 = vmatpush1.bf16.msra.mxu1 %v505_v25  ;;  %v295_v25 = vld [vmem:[%s788_s5 + $0x68] sm:$0xff] }
  0x4d   :  { %508 = vmatprep.subr.bf16.mxu1 %v507_v26  ;;  %v541_v26 = vpack.c.bf16 %v295_v25, %v294_v24 }
  0x4f   :  { %542 = vmatpush3.bf16.msra.mxu0 %v541_v26 }
  0x50   :  { %510 = vmatpush1.bf16.msra.mxu1 %v509_v29  ;;  %v543_v29 = vpack.c.bf16 %v313_v28, %v312_v27 }
  0x51   :  { %512 = vmatprep.subr.bf16.mxu1 %v511_v32  ;;  %v545_v32 = vpack.c.bf16 %v297_v31, %v296_v30 }
  0x52   :  { %544 = vmatprep.subr.bf16.mxu0 %v543_v29 }
  0x53   :  { %546 = vmatpush3.bf16.msra.mxu0 %v545_v32 }
  0x54   :  { %514 = vmatpush1.bf16.msra.mxu1 %v513_v35  ;;  %v206_v35 = vrot.slane %v197_v33, %v52_v15 }
  0xe9   :  { %v126_v18 = vpop.f32.mrb[0].mxu0 }
  0xea   :  { %v127_v19 = vadd.f32 %v126_v18, %v49_v16  ;;  %v128_v20 = vpop.f32.mrb[1].mxu0 }
  0xeb   :  { %v129_v21 = vadd.f32 %v128_v20, %v53_v17 }
  0xec   :  { %v131_v23 = vmax.f32 %v127_v19, 0.0 }
  0xed   :  { %v132_v22 = vmax.f32 %v129_v21, 0.0 }
  0xef   :  { %273 = vmatprep.mubr.f32.mxu1 %v132_v22 }
  0xf0   :  { %274 = vmatmul.mubr.f32.vlgmr.msra.gmra.mrb[0].mxu1 %v131_v23 }
 0x1c3   :  { %v275_v36 = vpop.f32.mrb[0].mxu1 }
 0x1c4   :  { %v276_v37 = vadd.f32 %v275_v36, %v202_v34  ;;  %v277_v38 = vpop.f32.mrb[1].mxu1 }
 0x1c5   :  { %v278_v39 = vadd.f32 %v277_v38, %v206_v35 }
 0x1c6   :  { %v280_v41 = vmax.f32 %v276_v37, 0.0 }
 0x1c7   :  { %v281_v40 = vmax.f32 %v278_v39, 0.0 }
 0x1c9   :  { %385 = vmatprep.mubr.f32.mxu0 %v281_v40 }
 0x1ca   :  { %386 = vmatmul.mubr.f32.vlgmr.msra.gmra.mrb[2].mxu0 %v280_v41 }
 0x29d   :  { %v448_v42 = vpop.f32.mrb[2].mxu0 }
 0x29e   :  { %v449_v44 = vpop.f32.mrb[3].mxu0 }
 0x29f   :  { %v450_v45 = vadd.f32 %v449_v44, %v448_v42 }
 0x2a1   :  { %v388_v47 = vadd.f32 %v450_v45, %v415_v43 }
 0x2a3   :  { %v393_v48 = vmax.f32 %v388_v47, -20.0 }
 0x2a5   :  { %v394_v49 = vmin.f32 %v393_v48, 2.0 }
 0x2a7   :  { %v396_v50 = vsel %vm395_vm1, %v388_v47, %v394_v49 }
 0x2a8   :  { %398 = vst.msk [vmem:[#allocation5] sm:$0xf] %vm397_vm2, %v396_v50 }
 0x2a9   :  { %585 = shalt.err (!%p582_p12)
}
 0x2aa   :  { %s586_s14 = scalar_lea.hbm %s790_s7, 64 }
 0x2ab   :  { %p587_p13 = scmp.ne.s32.totalorder %s790_s7, %s586_s14  ;;  %p590_p0 = scmp.lt.u32.totalorder %s586_s14, %s790_s7 }
 0x2ad   :  { %p592_p1 = pnand %p590_p0, %p587_p13 }
 0x2af   :  { %595 = shalt.err (!%p592_p1)
}
 0x2b0   :  { %408 = dma.vmem_to_hbm [thread:$0]  %s406_s11, 64, %s790_s7, [#allocation4]  }
 0x2b1   :  { %598 = dma.done.wait [#allocation4], 64  }
 0x2b2   :  { %599 = vsyncadd [#allocation4], 4294967232 }
 0x2b3   :  { %412 = vsyncpa [#allocation3], 1 }
 0x2b4   :  { %413 = vsyncpa [#allocation4], 1 }

</bundles_post_ra>
